<compile_context>
chip_gen: v7x
topology: tpu7x:2x2x1
jax: 0.10.0
libtpu: 0.0.40
codegen_flags: <defaults>
</compile_context>

<pallas_src>
import jax
import jax.numpy as jnp
from jax.experimental import pallas as pl
from jax.experimental.pallas import tpu as pltpu

LANE = 128


def _round_up(x, m):
    return (x + m - 1) // m * m


def _encoder_kernel(x_ref, eps_ref,
                    w1_ref, b1_ref,
                    w2_ref, b2_ref,
                    w3_ref, b3_ref,
                    wmu_ref, bmu_ref,
                    wlv_ref, blv_ref,
                    z_ref, mu_ref, logvar_ref):
    """Fused FC-VAE encoder: 3x(Linear+ReLU) + mu/logvar heads + reparametrize."""
    # bf16 matmul operands, f32 accumulation on the MXU.
    x = x_ref[...].astype(jnp.bfloat16)

    h = jnp.dot(x, w1_ref[...], preferred_element_type=jnp.float32) + b1_ref[...]
    h = jnp.maximum(h, 0.0)

    h = jnp.dot(h.astype(jnp.bfloat16), w2_ref[...],
                preferred_element_type=jnp.float32) + b2_ref[...]
    h = jnp.maximum(h, 0.0)

    h = jnp.dot(h.astype(jnp.bfloat16), w3_ref[...],
                preferred_element_type=jnp.float32) + b3_ref[...]
    h = jnp.maximum(h, 0.0)

    hb = h.astype(jnp.bfloat16)
    mu = jnp.dot(hb, wmu_ref[...], preferred_element_type=jnp.float32) + bmu_ref[...]
    logvar = jnp.dot(hb, wlv_ref[...], preferred_element_type=jnp.float32) + blv_ref[...]

    # Reparametrize: z = sigma * eps + mu, sigma = exp(0.5 * logvar).
    # exp() issues on the EUP slot; the FMA stays on the VPU in f32.
    sigma = jnp.exp(0.5 * logvar)
    z = sigma * eps_ref[...] + mu

    z_ref[...] = z.astype(z_ref.dtype)
    mu_ref[...] = mu.astype(mu_ref.dtype)
    logvar_ref[...] = logvar.astype(logvar_ref.dtype)


def encoder_forward(x, eps, params, *, tile_n=256):
    """Run the fused encoder kernel.

    x:      (N, 1, H, W) float32 with H*W == input_size
    eps:    (N, latent) float32 standard-normal draw (the reparametrization noise)
    params: dict with w1..w3 (in, out), b1..b3 (1, out), wmu/wlv (hidden, latent),
            bmu/blv (1, latent) -- all float32, weights stored (in, out).
    returns: (z, mu, logvar) each of shape (N, latent)
    """
    N = x.shape[0]
    input_size = params["w1"].shape[0]
    latent = params["wmu"].shape[1]

    in_pad = _round_up(input_size, LANE)    # 784 -> 896, lane-dense loads
    lat_pad = _round_up(latent, LANE)       # 16  -> 128, lane-dense stores

    n_pad = _round_up(max(N, 8), 8)
    tile_n = min(tile_n, n_pad)
    n_pad = _round_up(n_pad, tile_n)

    # Flatten + zero-pad input and noise.
    xf = x.reshape(N, -1).astype(jnp.float32)
    xf = jnp.pad(xf, ((0, n_pad - N), (0, in_pad - input_size)))
    epsf = jnp.pad(eps.astype(jnp.float32),
                   ((0, n_pad - N), (0, lat_pad - latent)))

    # bf16 weights (halved DMA), zero-padded to lane-dense shapes where needed.
    w1 = jnp.pad(params["w1"], ((0, in_pad - input_size), (0, 0))).astype(jnp.bfloat16)
    w2 = params["w2"].astype(jnp.bfloat16)
    w3 = params["w3"].astype(jnp.bfloat16)
    wmu = jnp.pad(params["wmu"], ((0, 0), (0, lat_pad - latent))).astype(jnp.bfloat16)
    wlv = jnp.pad(params["wlv"], ((0, 0), (0, lat_pad - latent))).astype(jnp.bfloat16)
    b1, b2, b3 = params["b1"], params["b2"], params["b3"]
    bmu = jnp.pad(params["bmu"], ((0, 0), (0, lat_pad - latent)))
    blv = jnp.pad(params["blv"], ((0, 0), (0, lat_pad - latent)))

    grid = (n_pad // tile_n,)

    def row_spec(cols):   # tiled over the batch axis
        return pl.BlockSpec((tile_n, cols), lambda i: (i, 0))

    def const_spec(shape):  # VMEM-resident across all grid steps
        return pl.BlockSpec(shape, lambda i: (0, 0))

    out_struct = jax.ShapeDtypeStruct((n_pad, lat_pad), jnp.float32)

    z_p, mu_p, lv_p = pl.pallas_call(
        _encoder_kernel,
        out_shape=(out_struct, out_struct, out_struct),
        grid_spec=pltpu.PrefetchScalarGridSpec(
            num_scalar_prefetch=0,
            grid=grid,
            in_specs=[
                row_spec(in_pad),                      # x (flattened, padded)
                row_spec(lat_pad),                     # eps (padded)
                const_spec(w1.shape), const_spec(b1.shape),
                const_spec(w2.shape), const_spec(b2.shape),
                const_spec(w3.shape), const_spec(b3.shape),
                const_spec(wmu.shape), const_spec(bmu.shape),
                const_spec(wlv.shape), const_spec(blv.shape),
            ],
            out_specs=(row_spec(lat_pad), row_spec(lat_pad), row_spec(lat_pad)),
        ),
        compiler_params=pltpu.CompilerParams(
            dimension_semantics=("parallel",)),
    )(xf, epsf, w1, b1, w2, b2, w3, b3, wmu, bmu, wlv, blv)

    z = z_p[:N, :latent]
    mu = mu_p[:N, :latent]
    logvar = lv_p[:N, :latent]
    return z, mu, logvar


def init_encoder_params(key, input_size, hidden_dim, latent_size):
    """PyTorch-style init: U(-1/sqrt(fan_in), 1/sqrt(fan_in)).
    Weights stored as (in_features, out_features)."""
    layers = {
        "1": (input_size, hidden_dim),
        "2": (hidden_dim, hidden_dim),
        "3": (hidden_dim, hidden_dim),
        "mu": (hidden_dim, latent_size),
        "lv": (hidden_dim, latent_size),
    }
    params = {}
    for name, (fan_in, fan_out) in layers.items():
        key, kw, kb = jax.random.split(key, 3)
        bound = 1.0 / jnp.sqrt(jnp.float32(fan_in))
        params[f"w{name}"] = jax.random.uniform(
            kw, (fan_in, fan_out), jnp.float32, -bound, bound)
        params[f"b{name}"] = jax.random.uniform(
            kb, (1, fan_out), jnp.float32, -bound, bound)
    return params


def encoder_ref(x, eps, params):
    """Pure-JAX reference with matched bf16 matmul precision."""
    def lin(h, w, b):
        return jnp.dot(h.astype(jnp.bfloat16), w.astype(jnp.bfloat16),
                       preferred_element_type=jnp.float32) + b

    h = x.reshape(x.shape[0], -1).astype(jnp.float32)
    h = jnp.maximum(lin(h, params["w1"], params["b1"]), 0.0)
    h = jnp.maximum(lin(h, params["w2"], params["b2"]), 0.0)
    h = jnp.maximum(lin(h, params["w3"], params["b3"]), 0.0)
    mu = lin(h, params["wmu"], params["bmu"])
    logvar = lin(h, params["wlv"], params["blv"])
    z = jnp.exp(0.5 * logvar) * eps + mu
    return z, mu, logvar


if __name__ == "__main__":
    # Module hyperparameters (MNIST-style FC-VAE encoder).
    input_size, hidden_dim, latent_size = 28 * 28, 32, 16
    N = 8  # batch

    key = jax.random.PRNGKey(0)
    key, kx, keps = jax.random.split(key, 3)
    x = jax.random.normal(kx, (N, 1, 28, 28), jnp.float32)
    # torch.randn_like(logvar) -> deterministic standard-normal eps generated here.
    eps = jax.random.normal(keps, (N, latent_size), jnp.float32)

    params = init_encoder_params(key, input_size, hidden_dim, latent_size)

    z, mu, logvar = encoder_forward(x, eps, params)
    z = jax.block_until_ready(z)

    assert z.shape == (N, latent_size), z.shape
    assert mu.shape == (N, latent_size), mu.shape
    assert logvar.shape == (N, latent_size), logvar.shape

    z_r, mu_r, lv_r = encoder_ref(x, eps, params)
    assert jnp.allclose(mu, mu_r, atol=1e-3, rtol=1e-3), "mu mismatch vs reference"
    assert jnp.allclose(logvar, lv_r, atol=1e-3, rtol=1e-3), "logvar mismatch vs reference"
    assert jnp.allclose(z, z_r, atol=1e-3, rtol=1e-3), "z mismatch vs reference"

    print("KERNEL_OK")
</pallas_src>

<mosaic_0001>
module attributes {stable_mosaic.version = 11 : i64} {
  func.func @_encoder_kernel(%arg0: i32, %arg1: memref<8x896xf32, #tpu.memory_space<vmem>>, %arg2: memref<8x128xf32, #tpu.memory_space<vmem>>, %arg3: memref<896x32xbf16, #tpu.memory_space<vmem>>, %arg4: memref<1x32xf32, #tpu.memory_space<vmem>>, %arg5: memref<32x32xbf16, #tpu.memory_space<vmem>>, %arg6: memref<1x32xf32, #tpu.memory_space<vmem>>, %arg7: memref<32x32xbf16, #tpu.memory_space<vmem>>, %arg8: memref<1x32xf32, #tpu.memory_space<vmem>>, %arg9: memref<32x128xbf16, #tpu.memory_space<vmem>>, %arg10: memref<1x128xf32, #tpu.memory_space<vmem>>, %arg11: memref<32x128xbf16, #tpu.memory_space<vmem>>, %arg12: memref<1x128xf32, #tpu.memory_space<vmem>>, %arg13: memref<8x128xf32, #tpu.memory_space<vmem>>, %arg14: memref<8x128xf32, #tpu.memory_space<vmem>>, %arg15: memref<8x128xf32, #tpu.memory_space<vmem>>) attributes {dimension_semantics = [#tpu.dimension_semantics<parallel>], iteration_bounds = array<i64: 1>, scalar_prefetch = 0 : i64, scratch_operands = 0 : i64, tpu.core_type = #tpu.core_type<tc>, window_params = [{transform_indices = @transform_0, window_bounds = array<i64: 8, 896>}, {transform_indices = @transform_1, window_bounds = array<i64: 8, 128>}, {pipeline_mode = #tpu.pipeline_mode<synchronous>, transform_indices = @transform_2, window_bounds = array<i64: 896, 32>}, {pipeline_mode = #tpu.pipeline_mode<synchronous>, transform_indices = @transform_3, window_bounds = array<i64: 1, 32>}, {pipeline_mode = #tpu.pipeline_mode<synchronous>, transform_indices = @transform_4, window_bounds = array<i64: 32, 32>}, {pipeline_mode = #tpu.pipeline_mode<synchronous>, transform_indices = @transform_5, window_bounds = array<i64: 1, 32>}, {pipeline_mode = #tpu.pipeline_mode<synchronous>, transform_indices = @transform_6, window_bounds = array<i64: 32, 32>}, {pipeline_mode = #tpu.pipeline_mode<synchronous>, transform_indices = @transform_7, window_bounds = array<i64: 1, 32>}, {pipeline_mode = #tpu.pipeline_mode<synchronous>, transform_indices = @transform_8, window_bounds = array<i64: 32, 128>}, {pipeline_mode = #tpu.pipeline_mode<synchronous>, transform_indices = @transform_9, window_bounds = array<i64: 1, 128>}, {pipeline_mode = #tpu.pipeline_mode<synchronous>, transform_indices = @transform_10, window_bounds = array<i64: 32, 128>}, {pipeline_mode = #tpu.pipeline_mode<synchronous>, transform_indices = @transform_11, window_bounds = array<i64: 1, 128>}, {transform_indices = @transform_12, window_bounds = array<i64: 8, 128>}, {transform_indices = @transform_13, window_bounds = array<i64: 8, 128>}, {transform_indices = @transform_14, window_bounds = array<i64: 8, 128>}]} {
    %c0 = arith.constant 0 : index
    %c0_0 = arith.constant 0 : index
    %0 = vector.load %arg1[%c0, %c0_0] : memref<8x896xf32, #tpu.memory_space<vmem>>, vector<8x896xf32>
    %1 = arith.truncf %0 : vector<8x896xf32> to vector<8x896xbf16>
    %c0_1 = arith.constant 0 : index
    %c0_2 = arith.constant 0 : index
    %2 = vector.load %arg3[%c0_1, %c0_2] : memref<896x32xbf16, #tpu.memory_space<vmem>>, vector<896x32xbf16>
    %cst = arith.constant dense<0.000000e+00> : vector<8x32xf32>
    %3 = tpu.matmul %1, %2, %cst {dimension_numbers = #tpu.dot_dimension_numbers<[1], [0], [0], [1], [0, 0, 1, 1], [], []>} : vector<8x896xbf16>, vector<896x32xbf16>, vector<8x32xf32> -> vector<8x32xf32>
    %c0_3 = arith.constant 0 : index
    %c0_4 = arith.constant 0 : index
    %4 = vector.load %arg4[%c0_3, %c0_4] : memref<1x32xf32, #tpu.memory_space<vmem>>, vector<1x32xf32>
    %5 = vector.broadcast %4 : vector<1x32xf32> to vector<8x32xf32>
    %6 = arith.addf %3, %5 : vector<8x32xf32>
    %cst_5 = arith.constant 0.000000e+00 : f32
    %7 = vector.broadcast %cst_5 : f32 to vector<8x32xf32>
    %8 = arith.maximumf %6, %7 : vector<8x32xf32>
    %9 = arith.truncf %8 : vector<8x32xf32> to vector<8x32xbf16>
    %c0_6 = arith.constant 0 : index
    %c0_7 = arith.constant 0 : index
    %10 = vector.load %arg5[%c0_6, %c0_7] : memref<32x32xbf16, #tpu.memory_space<vmem>>, vector<32x32xbf16>
    %cst_8 = arith.constant dense<0.000000e+00> : vector<8x32xf32>
    %11 = tpu.matmul %9, %10, %cst_8 {dimension_numbers = #tpu.dot_dimension_numbers<[1], [0], [0], [1], [0, 0, 1, 1], [], []>} : vector<8x32xbf16>, vector<32x32xbf16>, vector<8x32xf32> -> vector<8x32xf32>
    %c0_9 = arith.constant 0 : index
    %c0_10 = arith.constant 0 : index
    %12 = vector.load %arg6[%c0_9, %c0_10] : memref<1x32xf32, #tpu.memory_space<vmem>>, vector<1x32xf32>
    %13 = vector.broadcast %12 : vector<1x32xf32> to vector<8x32xf32>
    %14 = arith.addf %11, %13 : vector<8x32xf32>
    %cst_11 = arith.constant 0.000000e+00 : f32
    %15 = vector.broadcast %cst_11 : f32 to vector<8x32xf32>
    %16 = arith.maximumf %14, %15 : vector<8x32xf32>
    %17 = arith.truncf %16 : vector<8x32xf32> to vector<8x32xbf16>
    %c0_12 = arith.constant 0 : index
    %c0_13 = arith.constant 0 : index
    %18 = vector.load %arg7[%c0_12, %c0_13] : memref<32x32xbf16, #tpu.memory_space<vmem>>, vector<32x32xbf16>
    %cst_14 = arith.constant dense<0.000000e+00> : vector<8x32xf32>
    %19 = tpu.matmul %17, %18, %cst_14 {dimension_numbers = #tpu.dot_dimension_numbers<[1], [0], [0], [1], [0, 0, 1, 1], [], []>} : vector<8x32xbf16>, vector<32x32xbf16>, vector<8x32xf32> -> vector<8x32xf32>
    %c0_15 = arith.constant 0 : index
    %c0_16 = arith.constant 0 : index
    %20 = vector.load %arg8[%c0_15, %c0_16] : memref<1x32xf32, #tpu.memory_space<vmem>>, vector<1x32xf32>
    %21 = vector.broadcast %20 : vector<1x32xf32> to vector<8x32xf32>
    %22 = arith.addf %19, %21 : vector<8x32xf32>
    %cst_17 = arith.constant 0.000000e+00 : f32
    %23 = vector.broadcast %cst_17 : f32 to vector<8x32xf32>
    %24 = arith.maximumf %22, %23 : vector<8x32xf32>
    %25 = arith.truncf %24 : vector<8x32xf32> to vector<8x32xbf16>
    %c0_18 = arith.constant 0 : index
    %c0_19 = arith.constant 0 : index
    %26 = vector.load %arg9[%c0_18, %c0_19] : memref<32x128xbf16, #tpu.memory_space<vmem>>, vector<32x128xbf16>
    %cst_20 = arith.constant dense<0.000000e+00> : vector<8x128xf32>
    %27 = tpu.matmul %25, %26, %cst_20 {dimension_numbers = #tpu.dot_dimension_numbers<[1], [0], [0], [1], [0, 0, 1, 1], [], []>} : vector<8x32xbf16>, vector<32x128xbf16>, vector<8x128xf32> -> vector<8x128xf32>
    %c0_21 = arith.constant 0 : index
    %c0_22 = arith.constant 0 : index
    %28 = vector.load %arg10[%c0_21, %c0_22] : memref<1x128xf32, #tpu.memory_space<vmem>>, vector<1x128xf32>
    %29 = vector.broadcast %28 : vector<1x128xf32> to vector<8x128xf32>
    %30 = arith.addf %27, %29 : vector<8x128xf32>
    %c0_23 = arith.constant 0 : index
    %c0_24 = arith.constant 0 : index
    %31 = vector.load %arg11[%c0_23, %c0_24] : memref<32x128xbf16, #tpu.memory_space<vmem>>, vector<32x128xbf16>
    %cst_25 = arith.constant dense<0.000000e+00> : vector<8x128xf32>
    %32 = tpu.matmul %25, %31, %cst_25 {dimension_numbers = #tpu.dot_dimension_numbers<[1], [0], [0], [1], [0, 0, 1, 1], [], []>} : vector<8x32xbf16>, vector<32x128xbf16>, vector<8x128xf32> -> vector<8x128xf32>
    %c0_26 = arith.constant 0 : index
    %c0_27 = arith.constant 0 : index
    %33 = vector.load %arg12[%c0_26, %c0_27] : memref<1x128xf32, #tpu.memory_space<vmem>>, vector<1x128xf32>
    %34 = vector.broadcast %33 : vector<1x128xf32> to vector<8x128xf32>
    %35 = arith.addf %32, %34 : vector<8x128xf32>
    %cst_28 = arith.constant 5.000000e-01 : f32
    %36 = vector.broadcast %cst_28 : f32 to vector<8x128xf32>
    %37 = arith.mulf %36, %35 : vector<8x128xf32>
    %38 = math.exp %37 : vector<8x128xf32>
    %c0_29 = arith.constant 0 : index
    %c0_30 = arith.constant 0 : index
    %39 = vector.load %arg2[%c0_29, %c0_30] : memref<8x128xf32, #tpu.memory_space<vmem>>, vector<8x128xf32>
    %40 = arith.mulf %38, %39 : vector<8x128xf32>
    %41 = arith.addf %40, %30 : vector<8x128xf32>
    %c0_31 = arith.constant 0 : index
    %c0_32 = arith.constant 0 : index
    %42 = vector.load %arg13[%c0_31, %c0_32] : memref<8x128xf32, #tpu.memory_space<vmem>>, vector<8x128xf32>
    tpu.vector_store %arg13[%c0_31, %c0_32], %41 {strides = array<i32>} : memref<8x128xf32, #tpu.memory_space<vmem>>, vector<8x128xf32>,
    %c0_33 = arith.constant 0 : index
    %c0_34 = arith.constant 0 : index
    %43 = vector.load %arg14[%c0_33, %c0_34] : memref<8x128xf32, #tpu.memory_space<vmem>>, vector<8x128xf32>
    tpu.vector_store %arg14[%c0_33, %c0_34], %30 {strides = array<i32>} : memref<8x128xf32, #tpu.memory_space<vmem>>, vector<8x128xf32>,
    %c0_35 = arith.constant 0 : index
    %c0_36 = arith.constant 0 : index
    %44 = vector.load %arg15[%c0_35, %c0_36] : memref<8x128xf32, #tpu.memory_space<vmem>>, vector<8x128xf32>
    tpu.vector_store %arg15[%c0_35, %c0_36], %35 {strides = array<i32>} : memref<8x128xf32, #tpu.memory_space<vmem>>, vector<8x128xf32>,
    return
  }
  func.func @transform_0(%arg0: i32) -> (i32, i32) {
    %c0_i32 = arith.constant 0 : i32
    %c0_i32_0 = arith.constant 0 : i32
    return %arg0, %c0_i32 : i32, i32
  }
  func.func @transform_1(%arg0: i32) -> (i32, i32) {
    %c0_i32 = arith.constant 0 : i32
    %c0_i32_0 = arith.constant 0 : i32
    return %arg0, %c0_i32 : i32, i32
  }
  func.func @transform_2(%arg0: i32) -> (i32, i32) {
    %c0_i32 = arith.constant 0 : i32
    %c0_i32_0 = arith.constant 0 : i32
    %c0_i32_1 = arith.constant 0 : i32
    return %c0_i32, %c0_i32_0 : i32, i32
  }
  func.func @transform_3(%arg0: i32) -> (i32, i32) {
    %c0_i32 = arith.constant 0 : i32
    %c0_i32_0 = arith.constant 0 : i32
    %c0_i32_1 = arith.constant 0 : i32
    return %c0_i32, %c0_i32_0 : i32, i32
  }
  func.func @transform_4(%arg0: i32) -> (i32, i32) {
    %c0_i32 = arith.constant 0 : i32
    %c0_i32_0 = arith.constant 0 : i32
    %c0_i32_1 = arith.constant 0 : i32
    return %c0_i32, %c0_i32_0 : i32, i32
  }
  func.func @transform_5(%arg0: i32) -> (i32, i32) {
    %c0_i32 = arith.constant 0 : i32
    %c0_i32_0 = arith.constant 0 : i32
    %c0_i32_1 = arith.constant 0 : i32
    return %c0_i32, %c0_i32_0 : i32, i32
  }
  func.func @transform_6(%arg0: i32) -> (i32, i32) {
    %c0_i32 = arith.constant 0 : i32
    %c0_i32_0 = arith.constant 0 : i32
    %c0_i32_1 = arith.constant 0 : i32
    return %c0_i32, %c0_i32_0 : i32, i32
  }
  func.func @transform_7(%arg0: i32) -> (i32, i32) {
    %c0_i32 = arith.constant 0 : i32
    %c0_i32_0 = arith.constant 0 : i32
    %c0_i32_1 = arith.constant 0 : i32
    return %c0_i32, %c0_i32_0 : i32, i32
  }
  func.func @transform_8(%arg0: i32) -> (i32, i32) {
    %c0_i32 = arith.constant 0 : i32
    %c0_i32_0 = arith.constant 0 : i32
    %c0_i32_1 = arith.constant 0 : i32
    return %c0_i32, %c0_i32_0 : i32, i32
  }
  func.func @transform_9(%arg0: i32) -> (i32, i32) {
    %c0_i32 = arith.constant 0 : i32
    %c0_i32_0 = arith.constant 0 : i32
    %c0_i32_1 = arith.constant 0 : i32
    return %c0_i32, %c0_i32_0 : i32, i32
  }
  func.func @transform_10(%arg0: i32) -> (i32, i32) {
    %c0_i32 = arith.constant 0 : i32
    %c0_i32_0 = arith.constant 0 : i32
    %c0_i32_1 = arith.constant 0 : i32
    return %c0_i32, %c0_i32_0 : i32, i32
  }
  func.func @transform_11(%arg0: i32) -> (i32, i32) {
    %c0_i32 = arith.constant 0 : i32
    %c0_i32_0 = arith.constant 0 : i32
    %c0_i32_1 = arith.constant 0 : i32
    return %c0_i32, %c0_i32_0 : i32, i32
  }
  func.func @transform_12(%arg0: i32) -> (i32, i32) {
    %c0_i32 = arith.constant 0 : i32
    %c0_i32_0 = arith.constant 0 : i32
    return %arg0, %c0_i32 : i32, i32
  }
  func.func @transform_13(%arg0: i32) -> (i32, i32) {
    %c0_i32 = arith.constant 0 : i32
    %c0_i32_0 = arith.constant 0 : i32
    return %arg0, %c0_i32 : i32, i32
  }
  func.func @transform_14(%arg0: i32) -> (i32, i32) {
    %c0_i32 = arith.constant 0 : i32
    %c0_i32_0 = arith.constant 0 : i32
    return %arg0, %c0_i32 : i32, i32
  }
}

</mosaic_0001>

<bundles_post_ra>
// kernel: tpu_custom_call.1
= control target key start
LH: loop header
LB: loop body
LE: loop exit
PB: predicated region body
PF: predicated region fallthrough
CT: control target
= control target key end

     0   :  { %20 = vsyncpa [#allocation3], 0  ;;  %v1347_v43 = vmov 0.0   ;;  %vm1348_vm0 = vmmov 0   ;;  %s1731_s0 = inlined_call_operand.vmem [shape: f32[8,896], index: 0, kind: input, shape index: {}]   ;;  %s1732_s1 = inlined_call_operand.vmem [shape: f32[8,128], index: 1, kind: input, shape index: {}]   ;;  %s1733_s2 = inlined_call_operand.vmem [shape: bf16[896,32], index: 2, kind: input, shape index: {}]   ;;  %s1734_s3 = inlined_call_operand.vmem [shape: f32[1,32], index: 3, kind: input, shape index: {}]   ;;  %s1735_s4 = inlined_call_operand.vmem [shape: bf16[32,32], index: 4, kind: input, shape index: {}]   ;;  %s1736_s5 = inlined_call_operand.vmem [shape: f32[1,32], index: 5, kind: input, shape index: {}]   ;;  %s1737_s6 = inlined_call_operand.vmem [shape: bf16[32,32], index: 6, kind: input, shape index: {}]   ;;  %s1738_s7 = inlined_call_operand.vmem [shape: f32[1,32], index: 7, kind: input, shape index: {}]   ;;  %s1739_s8 = inlined_call_operand.vmem [shape: bf16[32,128], index: 8, kind: input, shape index: {}]   ;;  %s1740_s9 = inlined_call_operand.vmem [shape: f32[1,128], index: 9, kind: input, shape index: {}]   ;;  %s1741_s10 = inlined_call_operand.vmem [shape: bf16[32,128], index: 10, kind: input, shape index: {}]   ;;  %s1742_s11 = inlined_call_operand.vmem [shape: f32[1,128], index: 11, kind: input, shape index: {}]   ;;  %s1743_s12 = inlined_call_operand.hbm [shape: f32[8,128], index: 12, kind: output, shape index: {0}]   ;;  %s1744_s13 = inlined_call_operand.hbm [shape: f32[8,128], index: 13, kind: output, shape index: {1}]   ;;  %s1745_s14 = inlined_call_operand.hbm [shape: f32[8,128], index: 14, kind: output, shape index: {2}]  }
   0x1   :  { %v1211_v0 = vld [vmem:[%s1733_s2 + $0x40] sm:$0xff]   ;;  %v1215_v4 = vld [vmem:[%s1733_s2 + $0x48] sm:$0xff]   ;;  %v1219_v8 = vld [vmem:[%s1733_s2 + $0x50] sm:$0xff]  }
   0x2   :  { %v1212_v1 = vld [vmem:[%s1733_s2] sm:$0xff]   ;;  %1067 = vmatprep.subr.bf16.mxu0 %v1211_v0  ;;  %v1216_v5 = vld [vmem:[%s1733_s2 + $0x8] sm:$0xff]   ;;  %v1220_v9 = vld [vmem:[%s1733_s2 + $0x10] sm:$0xff]  }
   0x3   :  { %v1213_v2 = vld [vmem:[%s1733_s2 + $0xc0] sm:$0xff]   ;;  %1068 = vmatpush3.bf16.msra.mxu0 %v1212_v1  ;;  %v1217_v6 = vld [vmem:[%s1733_s2 + $0xc8] sm:$0xff]   ;;  %v1221_v10 = vld [vmem:[%s1733_s2 + $0xd0] sm:$0xff]  }
   0x4   :  { %v1214_v3 = vld [vmem:[%s1733_s2 + $0x80] sm:$0xff]   ;;  %1089 = vmatprep.subr.bf16.mxu1 %v1213_v2  ;;  %1069 = vmatprep.subr.bf16.mxu0 %v1215_v4  ;;  %v1218_v7 = vld [vmem:[%s1733_s2 + $0x88] sm:$0xff]   ;;  %v1222_v11 = vld [vmem:[%s1733_s2 + $0x90] sm:$0xff]  }
   0x5   :  { %1090 = vmatpush3.bf16.msra.mxu1 %v1214_v3  ;;  %v1223_v12 = vld [vmem:[%s1733_s2 + $0x58] sm:$0xff]   ;;  %v1227_v16 = vld [vmem:[%s1733_s2 + $0x60] sm:$0xff]   ;;  %v1231_v20 = vld [vmem:[%s1733_s2 + $0x68] sm:$0xff]  }
   0x6   :  { %1091 = vmatprep.subr.bf16.mxu1 %v1217_v6  ;;  %v1224_v13 = vld [vmem:[%s1733_s2 + $0x18] sm:$0xff]   ;;  %v1228_v17 = vld [vmem:[%s1733_s2 + $0x20] sm:$0xff]   ;;  %v1232_v21 = vld [vmem:[%s1733_s2 + $0x28] sm:$0xff]  }
   0x7   :  { %1070 = vmatpush3.bf16.msra.mxu0 %v1216_v5  ;;  %v1225_v14 = vld [vmem:[%s1733_s2 + $0xd8] sm:$0xff]   ;;  %v1229_v18 = vld [vmem:[%s1733_s2 + $0xe0] sm:$0xff]   ;;  %v1233_v22 = vld [vmem:[%s1733_s2 + $0xe8] sm:$0xff]  }
   0x8   :  { %1071 = vmatprep.subr.bf16.mxu0 %v1219_v8  ;;  %v1226_v15 = vld [vmem:[%s1733_s2 + $0x98] sm:$0xff]   ;;  %v1230_v19 = vld [vmem:[%s1733_s2 + $0xa0] sm:$0xff]   ;;  %v1234_v23 = vld [vmem:[%s1733_s2 + $0xa8] sm:$0xff]  }
   0x9   :  { %1092 = vmatpush3.bf16.msra.mxu1 %v1218_v7  ;;  %v1235_v24 = vld [vmem:[%s1733_s2 + $0x70] sm:$0xff]   ;;  %v1239_v28 = vld [vmem:[%s1733_s2 + $0x78] sm:$0xff]   ;;  %v48_v31 = vld [vmem:[%s1731_s0 + $0x8] sm:$0xff] }
   0xa   :  { %1093 = vmatprep.subr.bf16.mxu1 %v1221_v10  ;;  %v1236_v25 = vld [vmem:[%s1733_s2 + $0x30] sm:$0xff]   ;;  %v1240_v29 = vld [vmem:[%s1733_s2 + $0x38] sm:$0xff]   ;;  %v55_v32 = vpack.c.bf16 %v48_v31, %v48_v31  ;;  %v47_v34 = vld [vmem:[%s1731_s0] sm:$0xff] }
   0xb   :  { %1072 = vmatpush3.bf16.msra.mxu0 %v1220_v9  ;;  %v1237_v26 = vld [vmem:[%s1733_s2 + $0xf0] sm:$0xff]   ;;  %v1241_v30 = vld [vmem:[%s1733_s2 + $0xf8] sm:$0xff]   ;;  %v54_v35 = vpack.c.bf16 %v47_v34, %v47_v34  ;;  %v1243_v36 = vld [vmem:[%s1733_s2 + $0x140] sm:$0xff]  }
   0xc   :  { %1073 = vmatprep.subr.bf16.mxu0 %v1223_v12  ;;  %v1238_v27 = vld [vmem:[%s1733_s2 + $0xb0] sm:$0xff]   ;;  %v1242_v33 = vld [vmem:[%s1733_s2 + $0xb8] sm:$0xff]   ;;  %548 = vmatprep.mubr.bf16.mxu0 %v55_v32  ;;  %v1244_v39 = vld [vmem:[%s1733_s2 + $0x100] sm:$0xff]  }
   0xd   :  { %1094 = vmatpush3.bf16.msra.mxu1 %v1222_v11  ;;  %v50_v37 = vld [vmem:[%s1731_s0 + $0x18] sm:$0xff]  ;;  %v49_v40 = vld [vmem:[%s1731_s0 + $0x10] sm:$0xff]  ;;  %v1245_v42 = vld [vmem:[%s1733_s2 + $0x180] sm:$0xff]  }
   0xe   :  { %1095 = vmatprep.subr.bf16.mxu1 %v1225_v14  ;;  %v57_v38 = vpack.c.bf16 %v50_v37, %v50_v37  ;;  %v56_v41 = vpack.c.bf16 %v49_v40, %v49_v40  ;;  %v1246_v44 = vld [vmem:[%s1733_s2 + $0x148] sm:$0xff]   ;;  %v1249_v47 = vld [vmem:[%s1733_s2 + $0x150] sm:$0xff]   ;;  %v1252_v50 = vld [vmem:[%s1733_s2 + $0x158] sm:$0xff]  }
   0xf   :  { %1074 = vmatpush3.bf16.msra.mxu0 %v1224_v13  ;;  %v1247_v45 = vld [vmem:[%s1733_s2 + $0x108] sm:$0xff]   ;;  %v1250_v48 = vld [vmem:[%s1733_s2 + $0x110] sm:$0xff]   ;;  %v1253_v51 = vld [vmem:[%s1733_s2 + $0x118] sm:$0xff]  }
  0x10   :  { %1075 = vmatprep.subr.bf16.mxu0 %v1227_v16  ;;  %588 = vmatprep.mubr.bf16.mxu1 %v57_v38  ;;  %v1248_v46 = vld [vmem:[%s1733_s2 + $0x188] sm:$0xff]   ;;  %v1251_v49 = vld [vmem:[%s1733_s2 + $0x190] sm:$0xff]   ;;  %v1255_v52 = vld [vmem:[%s1733_s2 + $0x160] sm:$0xff]  }
  0x11   :  { %1096 = vmatpush3.bf16.msra.mxu1 %v1226_v15  ;;  %v1254_v53 = vld [vmem:[%s1733_s2 + $0x198] sm:$0xff]   ;;  %v1256_v54 = vld [vmem:[%s1733_s2 + $0x120] sm:$0xff]   ;;  %v1258_v55 = vld [vmem:[%s1733_s2 + $0x168] sm:$0xff]  }
  0x12   :  { %1097 = vmatprep.subr.bf16.mxu1 %v1229_v18  ;;  %v1257_v56 = vld [vmem:[%s1733_s2 + $0x1a0] sm:$0xff]   ;;  %v1259_v57 = vld [vmem:[%s1733_s2 + $0x128] sm:$0xff]   ;;  %v1261_v58 = vld [vmem:[%s1733_s2 + $0x170] sm:$0xff]  }
  0x13   :  { %1076 = vmatpush3.bf16.msra.mxu0 %v1228_v17  ;;  %v1260_v59 = vld [vmem:[%s1733_s2 + $0x1a8] sm:$0xff]   ;;  %v1262_v60 = vld [vmem:[%s1733_s2 + $0x130] sm:$0xff]   ;;  %v1264_v63 = vld [vmem:[%s1733_s2 + $0x178] sm:$0xff]  }
  0x14   :  { %1077 = vmatprep.subr.bf16.mxu0 %v1231_v20  ;;  %v52_v61 = vld [vmem:[%s1731_s0 + $0x28] sm:$0xff]  ;;  %v1263_v62 = vld [vmem:[%s1733_s2 + $0x1b0] sm:$0xff]   ;;  %v1265_v1 = vld [vmem:[%s1733_s2 + $0x138] sm:$0xff]  }
  0x15   :  { %1098 = vmatpush3.bf16.msra.mxu1 %v1230_v19  ;;  %v59_v0 = vpack.c.bf16 %v52_v61, %v52_v61  ;;  %v51_v2 = vld [vmem:[%s1731_s0 + $0x20] sm:$0xff]  ;;  %v1266_v3 = vld [vmem:[%s1733_s2 + $0x1b8] sm:$0xff]   ;;  %v53_v4 = vld [vmem:[%s1731_s0 + $0x30] sm:$0xff] }
  0x16   :  { %1099 = vmatprep.subr.bf16.mxu1 %v1233_v22  ;;  %v58_v5 = vpack.c.bf16 %v51_v2, %v51_v2 }
  0x17   :  { %1078 = vmatpush3.bf16.msra.mxu0 %v1232_v21 }
  0x18   :  { %1079 = vmatprep.subr.bf16.mxu0 %v1235_v24 }
  0x19   :  { %1100 = vmatpush3.bf16.msra.mxu1 %v1234_v23 }
  0x1a   :  { %1101 = vmatprep.subr.bf16.mxu1 %v1237_v26 }
  0x1b   :  { %1080 = vmatpush3.bf16.msra.mxu0 %v1236_v25 }
  0x1c   :  { %1081 = vmatprep.subr.bf16.mxu0 %v1239_v28 }
  0x1d   :  { %1102 = vmatpush3.bf16.msra.mxu1 %v1238_v27 }
  0x1e   :  { %1103 = vmatprep.subr.bf16.mxu1 %v1241_v30 }
  0x1f   :  { %1082 = vmatpush3.bf16.msra.mxu0 %v1240_v29 }
  0x20   :  { %1111 = vmatprep.subr.bf16.mxu0 %v1243_v36 }
  0x21   :  { %1104 = vmatpush3.bf16.msra.mxu1 %v1242_v33 }
  0x22   :  { %549 = vmatmul.mubr.bf16.vlgmr.msra.gmra.mrb[0].mxu0 %v54_v35  ;;  %1154 = vmatprep.subr.bf16.mxu1 %v1347_v43 }
  0x23   :  { %1112 = vmatpush3.bf16.msra.mxu0 %v1244_v39  ;;  %628 = vmatprep.mubr.bf16.mxu0 %v59_v0 }
  0x24   :  { %589 = vmatmul.mubr.bf16.vlgmr.msra.gmra.mrb[0].mxu1 %v56_v41  ;;  %1113 = vmatprep.subr.bf16.mxu0 %v1246_v44 }
  0x25   :  { %1155 = vmatpush3.bf16.msra.mxu1 %v1245_v42  ;;  %1170 = vmatprep.mubr.msk.bf16.mxu1 %vm1348_vm0, %v1347_v43 }
  0x26   :  { %1156 = vmatprep.subr.bf16.mxu1 %v1347_v43 }
  0x27   :  { %1114 = vmatpush3.bf16.msra.mxu0 %v1247_v45 }
  0x28   :  { %1115 = vmatprep.subr.bf16.mxu0 %v1249_v47 }
  0x29   :  { %1157 = vmatpush3.bf16.msra.mxu1 %v1248_v46 }
  0x2a   :  { %1158 = vmatprep.subr.bf16.mxu1 %v1347_v43 }
  0x2b   :  { %1116 = vmatpush3.bf16.msra.mxu0 %v1250_v48 }
  0x2c   :  { %1117 = vmatprep.subr.bf16.mxu0 %v1252_v50 }
  0x2d   :  { %1159 = vmatpush3.bf16.msra.mxu1 %v1251_v49 }
  0x2e   :  { %1160 = vmatprep.subr.bf16.mxu1 %v1347_v43 }
  0x2f   :  { %1118 = vmatpush3.bf16.msra.mxu0 %v1253_v51 }
  0x30   :  { %1119 = vmatprep.subr.bf16.mxu0 %v1255_v52 }
  0x31   :  { %1161 = vmatpush3.bf16.msra.mxu1 %v1254_v53 }
  0x32   :  { %1162 = vmatprep.subr.bf16.mxu1 %v1347_v43 }
  0x33   :  { %1120 = vmatpush3.bf16.msra.mxu0 %v1256_v54 }
  0x34   :  { %1121 = vmatprep.subr.bf16.mxu0 %v1258_v55 }
  0x35   :  { %1163 = vmatpush3.bf16.msra.mxu1 %v1257_v56 }
  0x36   :  { %1164 = vmatprep.subr.bf16.mxu1 %v1347_v43 }
  0x37   :  { %1122 = vmatpush3.bf16.msra.mxu0 %v1259_v57 }
  0x38   :  { %1123 = vmatprep.subr.bf16.mxu0 %v1261_v58 }
  0x39   :  { %1165 = vmatpush3.bf16.msra.mxu1 %v1260_v59 }
  0x3a   :  { %1166 = vmatprep.subr.bf16.mxu1 %v1347_v43 }
  0x3b   :  { %1124 = vmatpush3.bf16.msra.mxu0 %v1262_v60 }
  0x3c   :  { %1125 = vmatprep.subr.bf16.mxu0 %v1264_v63 }
  0x3d   :  { %1167 = vmatpush3.bf16.msra.mxu1 %v1263_v62 }
  0x3e   :  { %21 = vsyncpa [#allocation5], 0  ;;  %1168 = vmatprep.subr.bf16.mxu1 %v1347_v43  ;;  %v60_v6 = vpack.c.bf16 %v53_v4, %v53_v4  ;;  %v1267_v7 = vld [vmem:[%s1735_s4] sm:$0xff]   ;;  %v1268_v8 = vld [vmem:[%s1735_s4 + $0x8] sm:$0xff]   ;;  %vm701_vm1 = vcmask 261120   ;;  %s1350_s28 = smov [#allocation6]  }
  0x3f   :  { %1126 = vmatpush3.bf16.msra.mxu0 %v1265_v1  ;;  %v1269_v9 = vld [vmem:[%s1737_s6] sm:$0xff]   ;;  %v1270_v36 = vld [vmem:[%s1737_s6 + $0x8] sm:$0xff]   ;;  %s979_s29 = sshll.u32 %s1350_s28, 4  ;;  %s1685_s29 = int_to_ptr.vmem [resolvable:$true] %s979_s29 }
  0x40   :  { %1174 = vmatprep.subr.bf16.mxu0 %v1347_v43  ;;  %v994_v11 = vld [vmem:[%s1734_s3] ss:$0 sm:$0xff]  ;;  %v1273_v48 = vld [vmem:[%s1741_s10 + $0x8] sm:$0xff]  }
  0x41   :  { %1169 = vmatpush3.bf16.msra.mxu1 %v1266_v3  ;;  %v1051_v37 = vld [vmem:[%s1736_s5] ss:$0 sm:$0xff]  ;;  %v1274_v49 = vld [vmem:[%s1739_s8 + $0x8] sm:$0xff]  }
  0x42   :  { %629 = vmatmul.mubr.bf16.vlgmr.msra.gmra.mrb[4].mxu0 %v58_v5  ;;  %1182 = vmatprep.subr.bf16.mxu1 %v1347_v43  ;;  %v1271_v45 = vld [vmem:[%s1741_s10] sm:$0xff]  }
  0x43   :  { %1178 = vmatprep.mubr.msk.bf16.mxu0 %vm1348_vm0, %v1347_v43  ;;  %1175 = vmatpush3.bf16.msra.mxu0 %v1267_v7  ;;  %v1272_v47 = vld [vmem:[%s1739_s8] sm:$0xff]  }
  0x44   :  { %1171 = vmatmul.mubr.bf16.vlgmr.msra.gmra.mrb[4].mxu1 %v60_v6  ;;  %1176 = vmatprep.subr.bf16.mxu0 %v1347_v43  ;;  %v1055_v50 = vld [vmem:[%s1738_s7] ss:$0 sm:$0xff]  ;;  %s1349_s7 = smov [#allocation4]  }
  0x45   :  { %1186 = vmatprep.mubr.msk.bf16.mxu1 %vm1348_vm0, %v1347_v43  ;;  %1183 = vmatpush3.bf16.msra.mxu1 %v1269_v9  ;;  %v1059_v57 = vld [vmem:[%s1740_s9] ss:$0 sm:$0xff]  ;;  %s969_s27 = sshll.u32 %s1349_s7, 4  ;;  %s970_s27 = int_to_ptr.vmem [resolvable:$true] %s969_s27 }
  0x46   :  { %1184 = vmatprep.subr.bf16.mxu1 %v1347_v43  ;;  %v1063_v58 = vld [vmem:[%s1742_s11] ss:$0 sm:$0xff]  ;;  %s1277_s9 = scalar_lea.vmem %s970_s27, 128  ;;  %p1282_p1 = scmp.lt.s32.totalorder %s970_s27, %s970_s27 }
  0x47   :  { %1177 = vmatpush3.bf16.msra.mxu0 %v1268_v8  ;;  %p1278_p0 = scmp.ne.s32.totalorder %s970_s27, %s1277_s9  ;;  %p1283_p2 = scmp.lt.s32.totalorder %s1277_s9, %s1277_s9 }
  0x48   :  { %1190 = vmatprep.subr.bf16.mxu0 %v1347_v43 }
  0x49   :  { %1185 = vmatpush3.bf16.msra.mxu1 %v1270_v36  ;;  %p1284_p3 = por %p1283_p2, %p1282_p1 }
  0x4a   :  { %1198 = vmatprep.subr.bf16.mxu1 %v1347_v43 }
  0x4b   :  { %p1285_p4 = pnand %p1284_p3, %p1278_p0 }
  0xf5   :  { %v1083_v10 = vpop.f32.mrb[0].mxu0 }
  0xf6   :  { %v1084_v12 = vpop.f32.mrb[1].mxu0 }
  0xf7   :  { %v1085_v13 = vadd.f32 %v1084_v12, %v1083_v10  ;;  %v1086_v14 = vpop.f32.mrb[2].mxu0  ;;  %v1105_v15 = vpop.f32.mrb[0].mxu1 }
  0xf8   :  { %v1087_v16 = vpop.f32.mrb[3].mxu0  ;;  %v1106_v18 = vpop.f32.mrb[1].mxu1 }
  0xf9   :  { %v551_v17 = vadd.f32 %v1085_v13, %v994_v11  ;;  %v1107_v19 = vadd.f32 %v1106_v18, %v1105_v15  ;;  %v1108_v20 = vpop.f32.mrb[2].mxu1 }
  0xfa   :  { %v1109_v21 = vpop.f32.mrb[3].mxu1 }
  0xfb   :  { %v591_v22 = vadd.f32 %v1107_v19, %v551_v17 }
 0x115   :  { %v1127_v23 = vpop.f32.mrb[4].mxu0 }
 0x116   :  { %v1128_v24 = vpop.f32.mrb[5].mxu0 }
 0x117   :  { %v1129_v25 = vadd.f32 %v1128_v24, %v1127_v23  ;;  %v1130_v26 = vpop.f32.mrb[6].mxu0  ;;  %v670_v27 = vpop.f32.mrb[4].mxu1 }
 0x118   :  { %v1131_v28 = vpop.f32.mrb[7].mxu0  ;;  %v1172_v30 = vpop.f32.mrb[5].mxu1 }
 0x119   :  { %v631_v29 = vadd.f32 %v1129_v25, %v591_v22  ;;  %v673_v31 = vpop.f32.mrb[6].mxu1 }
 0x11a   :  { %v1173_v33 = vpop.f32.mrb[7].mxu1 }
 0x11b   :  { %v671_v32 = vadd.f32 %v670_v27, %v631_v29 }
 0x11d   :  { %v676_v34 = vmax.f32 %v671_v32, 0.0 }
 0x11f   :  { %v677_v35 = vpack.c.bf16 %v676_v34, %v676_v34 }
 0x121   :  { %1179 = vmatmul.mubr.msk.bf16.vlgmr.msra.gmra.mrb[8].mxu0 %vm701_vm1, %v677_v35 }
 0x122   :  { %1194 = vmatprep.mubr.msk.bf16.mxu0 %vm1348_vm0, %v1347_v43  ;;  %1191 = vmatpush3.bf16.msra.mxu0 %v1272_v47 }
 0x123   :  { %1192 = vmatprep.subr.bf16.mxu0 %v1347_v43 }
 0x126   :  { %1193 = vmatpush3.bf16.msra.mxu0 %v1274_v49 }
 0x1f4   :  { %v739_v38 = vpop.f32.mrb[8].mxu0 }
 0x1f5   :  { %v740_v39 = vadd.f32 %v1051_v37, %v739_v38  ;;  %v1180_v40 = vpop.f32.mrb[9].mxu0 }
 0x1f6   :  { %v742_v41 = vpop.f32.mrb[10].mxu0 }
 0x1f7   :  { %v745_v42 = vmax.f32 %v740_v39, 0.0  ;;  %v1181_v44 = vpop.f32.mrb[11].mxu0 }
 0x1f9   :  { %v746_v46 = vpack.c.bf16 %v745_v42, %v745_v42 }
 0x1fb   :  { %1187 = vmatmul.mubr.msk.bf16.vlgmr.msra.gmra.mrb[8].mxu1 %vm701_vm1, %v746_v46 }
 0x1fc   :  { %1199 = vmatpush3.bf16.msra.mxu1 %v1271_v45  ;;  %1202 = vmatprep.mubr.msk.bf16.mxu1 %vm1348_vm0, %v1347_v43 }
 0x1fd   :  { %1200 = vmatprep.subr.bf16.mxu1 %v1347_v43 }
 0x200   :  { %1201 = vmatpush3.bf16.msra.mxu1 %v1273_v48 }
 0x2ce   :  { %v807_v51 = vpop.f32.mrb[8].mxu1 }
 0x2cf   :  { %v808_v52 = vadd.f32 %v1055_v50, %v807_v51  ;;  %v1188_v53 = vpop.f32.mrb[9].mxu1 }
 0x2d0   :  { %v810_v54 = vpop.f32.mrb[10].mxu1 }
 0x2d1   :  { %v813_v55 = vmax.f32 %v808_v52, 0.0  ;;  %v1189_v43 = vpop.f32.mrb[11].mxu1 }
 0x2d3   :  { %v814_v56 = vpack.c.bf16 %v813_v55, %v813_v55 }
 0x2d5   :  { %1195 = vmatmul.mubr.msk.bf16.vlgmr.msra.gmra.mrb[12].mxu0 %vm701_vm1, %v814_v56  ;;  %1203 = vmatmul.mubr.msk.bf16.vlgmr.msra.gmra.mrb[12].mxu1 %vm701_vm1, %v814_v56 }
 0x3a8   :  { %v875_v59 = vpop.f32.mrb[12].mxu0  ;;  %v938_v60 = vpop.f32.mrb[12].mxu1 }
 0x3a9   :  { %v876_v61 = vadd.f32 %v1059_v57, %v875_v59  ;;  %v939_v62 = vadd.f32 %v1063_v58, %v938_v60  ;;  %v1196_v63 = vpop.f32.mrb[13].mxu0  ;;  %v1204_v0 = vpop.f32.mrb[13].mxu1 }
 0x3aa   :  { %v878_v1 = vpop.f32.mrb[14].mxu0  ;;  %v941_v2 = vpop.f32.mrb[14].mxu1 }
 0x3ab   :  { %951 = vst [vmem:[#allocation4] sm:$0xff] %v876_v61  ;;  %v944_v3 = vmul.f32 0.5, %v939_v62  ;;  %952 = vst [vmem:[#allocation6] sm:$0xff] %v939_v62  ;;  %v1197_v4 = vpop.f32.mrb[15].mxu0  ;;  %v1205_v5 = vpop.f32.mrb[15].mxu1 }
 0x3ac   :  { %1288 = shalt.err (!%p1285_p4)
}
 0x3ad   :  { %s1289_s15 = scalar_lea.hbm %s1744_s13, 128 }
 0x3ae   :  { %p1290_p5 = scmp.ne.s32.totalorder %s1744_s13, %s1289_s15  ;;  %p1293_p6 = scmp.lt.u32.totalorder %s1289_s15, %s1744_s13 }
 0x3b0   :  { %p1295_p7 = pnand %p1293_p6, %p1290_p5 }
 0x3b2   :  { %1298 = shalt.err (!%p1295_p7)
}
 0x3b3   :  { %972 = dma.vmem_to_hbm [thread:$0]  %s970_s27, 128, %s1744_s13, [#allocation5]   ;;  %v945_v6 = vmul.f32 1.442695, %v944_v3 }
 0x3b4   :  { %s1299_s20 = scalar_lea.vmem %s1685_s29, 128  ;;  %p1304_p9 = scmp.lt.s32.totalorder %s1685_s29, %s1685_s29 }
 0x3b5   :  { %p1300_p8 = scmp.ne.s32.totalorder %s1685_s29, %s1299_s20  ;;  %p1305_p10 = scmp.lt.s32.totalorder %s1299_s20, %s1299_s20 }
 0x3b7   :  { %p1306_p11 = por %p1305_p10, %p1304_p9 }
 0x3b9   :  { %p1307_p12 = pnand %p1306_p11, %p1300_p8 }
 0x3bb   :  { %1310 = shalt.err (!%p1307_p12)
}
 0x3bc   :  { %s1311_s21 = scalar_lea.hbm %s1745_s14, 128 }
 0x3bd   :  { %p1312_p13 = scmp.ne.s32.totalorder %s1745_s14, %s1311_s21  ;;  %p1315_p0 = scmp.lt.u32.totalorder %s1311_s21, %s1745_s14 }
 0x3bf   :  { %p1317_p1 = pnand %p1315_p0, %p1312_p13 }
 0x3c1   :  { %1320 = shalt.err (!%p1317_p1)
}
 0x3c2   :  { %982 = dma.vmem_to_hbm [thread:$0]  %s1685_s29, 128, %s1745_s14, [#allocation5]   ;;  %1275 = vpow2.f32 %v945_v6  ;;  %v947_v7 = vld [vmem:[%s1732_s1] sm:$0xff] }
 0x3c3   :  { %s1351_s8 = smov [#allocation2]  }
 0x3c4   :  { %s959_s2 = sshll.u32 %s1351_s8, 4  ;;  %s960_s2 = int_to_ptr.vmem [resolvable:$true] %s959_s2 }
 0x3c5   :  { %s1321_s7 = scalar_lea.vmem %s960_s2, 128  ;;  %p1326_p3 = scmp.lt.s32.totalorder %s960_s2, %s960_s2 }
 0x3c6   :  { %p1322_p2 = scmp.ne.s32.totalorder %s960_s2, %s1321_s7  ;;  %p1327_p4 = scmp.lt.s32.totalorder %s1321_s7, %s1321_s7 }
 0x3c8   :  { %p1328_p5 = por %p1327_p4, %p1326_p3 }
 0x3ca   :  { %p1329_p6 = pnand %p1328_p5, %p1322_p2 }
 0x3cc   :  { %v1276_v8 = vpop.eup %1275 }
 0x3cd   :  { %v948_v9 = vmul.f32 %v1276_v8, %v947_v7 }
 0x3cf   :  { %v949_v10 = vadd.f32 %v948_v9, %v876_v61 }
 0x3d1   :  { %950 = vst [vmem:[#allocation2] sm:$0xff] %v949_v10 }
 0x3d2   :  { %1332 = shalt.err (!%p1329_p6)
}
 0x3d3   :  { %s1333_s28 = scalar_lea.hbm %s1743_s12, 128 }
 0x3d4   :  { %p1334_p7 = scmp.ne.s32.totalorder %s1743_s12, %s1333_s28  ;;  %p1337_p8 = scmp.lt.u32.totalorder %s1333_s28, %s1743_s12 }
 0x3d6   :  { %p1339_p9 = pnand %p1337_p8, %p1334_p7 }
 0x3d8   :  { %1342 = shalt.err (!%p1339_p9)
}
 0x3d9   :  { %962 = dma.vmem_to_hbm [thread:$0]  %s960_s2, 128, %s1743_s12, [#allocation3]  }
 0x3da   :  { %1343 = dma.done.wait [#allocation3], 128  }
 0x3db   :  { %1344 = vsyncadd [#allocation3], 4294967168 }
 0x3dc   :  { %1345 = dma.done.wait [#allocation5], 256  }
 0x3dd   :  { %1346 = vsyncadd [#allocation5], 4294967040 }
 0x3de   :  { %992 = vsyncpa [#allocation3], 1 }
 0x3df   :  { %993 = vsyncpa [#allocation5], 1 }

</bundles_post_ra>
